<compile_context>
chip_gen: v5e
topology: v5e:2x2
jax: 0.10.0
libtpu: 0.0.40
codegen_flags: <defaults>
</compile_context>

<pallas_src>
import math

import jax
import jax.numpy as jnp
from jax import lax
from jax.experimental import pallas as pl
from jax.experimental.pallas import tpu as pltpu


def _round_up(v, m):
    return ((v + m - 1) // m) * m


def _npc_kernel_single_k(x_ref, mem_ref, invT_ref, out_ref):
    """out tile = (x_tile @ mem_tile.T) * (1/T); full feature axis in one tile."""
    out_ref[...] = (
        lax.dot_general(
            x_ref[...], mem_ref[...],
            dimension_numbers=(((1,), (1,)), ((), ())),
            preferred_element_type=jnp.float32,
        ) * invT_ref[0, 0]
    ).astype(out_ref.dtype)


def _npc_kernel_tiled_k(x_ref, mem_ref, invT_ref, out_ref, acc_ref):
    """Tiled-K variant (used only when the feature dim is too large for one tile)."""
    k = pl.program_id(2)

    @pl.when(k == 0)
    def _():
        acc_ref[...] = jnp.zeros_like(acc_ref)

    acc_ref[...] += lax.dot_general(
        x_ref[...], mem_ref[...],
        dimension_numbers=(((1,), (1,)), ((), ())),
        preferred_element_type=jnp.float32,
    )

    @pl.when(k == pl.num_programs(2) - 1)
    def _():
        out_ref[...] = (acc_ref[...] * invT_ref[0, 0]).astype(out_ref.dtype)


@jax.jit
def non_parametric_classifier_forward(x, memory, T):
    """out = (x @ memory.T) / T via a tiled Pallas matmul kernel."""
    B, D = x.shape
    N, D2 = memory.shape
    assert D == D2, "feature dims must match"

    # ---- static tile selection (shapes are static under jit) -------------
    tm = min(_round_up(B, 8), 256)                 # cover the whole batch when possible
    tn = 512 if N >= 512 else _round_up(N, 128)    # lane-dense, 256-aligned for N>=512
    MAX_SINGLE_TK = 1024                           # f32: keeps double-buffered tiles < ~8 MiB
    Dp = _round_up(D, 128)
    single_k = Dp <= MAX_SINGLE_TK
    tk = Dp if single_k else 512
    if not single_k:
        Dp = _round_up(D, tk)
    Bp = _round_up(B, tm)
    Np = _round_up(N, tn)

    # ---- zero-pad: padded features add 0 to the dot; padded rows sliced off
    x_p = jnp.pad(x.astype(jnp.float32), ((0, Bp - B), (0, Dp - D)))
    m_p = jnp.pad(memory.astype(jnp.float32), ((0, Np - N), (0, Dp - D)))
    inv_T = jnp.reshape(1.0 / T, (1, 1)).astype(jnp.float32)

    if single_k:
        out_p = pl.pallas_call(
            _npc_kernel_single_k,
            out_shape=jax.ShapeDtypeStruct((Bp, Np), jnp.float32),
            grid_spec=pltpu.PrefetchScalarGridSpec(
                num_scalar_prefetch=0,
                grid=(Bp // tm, Np // tn),
                in_specs=[
                    pl.BlockSpec((tm, Dp), lambda i, j: (i, 0)),   # x tile (constant over j)
                    pl.BlockSpec((tn, Dp), lambda i, j: (j, 0)),   # memory tile
                    pl.BlockSpec(memory_space=pltpu.SMEM),         # 1/T scalar
                ],
                out_specs=pl.BlockSpec((tm, tn), lambda i, j: (i, j)),
            ),
            compiler_params=pltpu.CompilerParams(
                dimension_semantics=("parallel", "parallel"),
            ),
        )(x_p, m_p, inv_T)
    else:
        out_p = pl.pallas_call(
            _npc_kernel_tiled_k,
            out_shape=jax.ShapeDtypeStruct((Bp, Np), jnp.float32),
            grid_spec=pltpu.PrefetchScalarGridSpec(
                num_scalar_prefetch=0,
                grid=(Bp // tm, Np // tn, Dp // tk),
                in_specs=[
                    pl.BlockSpec((tm, tk), lambda i, j, k: (i, k)),   # x tile
                    pl.BlockSpec((tn, tk), lambda i, j, k: (j, k)),   # memory tile
                    pl.BlockSpec(memory_space=pltpu.SMEM),            # 1/T scalar
                ],
                out_specs=pl.BlockSpec((tm, tn), lambda i, j, k: (i, j)),
                scratch_shapes=[pltpu.VMEM((tm, tn), jnp.float32)],
            ),
            compiler_params=pltpu.CompilerParams(
                dimension_semantics=("parallel", "parallel", "arbitrary"),
            ),
        )(x_p, m_p, inv_T)

    return out_p[:B, :N].astype(x.dtype)


if __name__ == "__main__":
    # Small shapes consistent with the module; N and B deliberately not tile
    # multiples to exercise the padding path.
    batch = 6
    input_size = 128
    output_size = 200
    T = 0.05
    momentum = 0.5  # only used in backward / memory update; unused in forward

    key = jax.random.PRNGKey(0)
    kx, kmem, ky = jax.random.split(key, 3)

    # Deterministic "memory" buffer init, mirroring torch.rand(...)*2*stdv - stdv
    stdv = 1.0 / math.sqrt(input_size / 3)
    memory = jax.random.uniform(kmem, (output_size, input_size), dtype=jnp.float32,
                                minval=-stdv, maxval=stdv)

    # L2-normalized features, as the instance-discrimination model typically feeds.
    x = jax.random.normal(kx, (batch, input_size), dtype=jnp.float32)
    x = x / jnp.linalg.norm(x, axis=1, keepdims=True)

    # Labels (unused in forward, kept for API parity with the PyTorch module).
    y = jax.random.randint(ky, (batch,), 0, output_size, dtype=jnp.int32)

    out = non_parametric_classifier_forward(x, memory, T)
    out = jax.block_until_ready(out)

    ref = (x @ memory.T) / T
    assert out.shape == (batch, output_size)
    assert jnp.allclose(out, ref, atol=1e-4, rtol=1e-4), "mismatch vs reference (single-K path)"

    # Also exercise the tiled-K path (feature dim larger than the single-tile cap).
    B2, D2sz, N2 = 4, 1536, 256
    k2x, k2m = jax.random.split(jax.random.PRNGKey(1))
    x2 = jax.random.normal(k2x, (B2, D2sz), dtype=jnp.float32)
    x2 = x2 / jnp.linalg.norm(x2, axis=1, keepdims=True)
    mem2 = jax.random.uniform(k2m, (N2, D2sz), dtype=jnp.float32, minval=-0.1, maxval=0.1)
    out2 = jax.block_until_ready(non_parametric_classifier_forward(x2, mem2, T))
    ref2 = (x2 @ mem2.T) / T
    assert jnp.allclose(out2, ref2, atol=1e-3, rtol=1e-4), "mismatch vs reference (tiled-K path)"

    print("KERNEL_OK")
</pallas_src>

<mosaic_0001>
module attributes {stable_mosaic.version = 11 : i64} {
  func.func @_npc_kernel_single_k(%arg0: i32, %arg1: i32, %arg2: memref<8x128xf32, #tpu.memory_space<vmem>>, %arg3: memref<256x128xf32, #tpu.memory_space<vmem>>, %arg4: memref<1x1xf32, #tpu.memory_space<smem>>, %arg5: memref<8x256xf32, #tpu.memory_space<vmem>>) attributes {dimension_semantics = [#tpu.dimension_semantics<parallel>, #tpu.dimension_semantics<parallel>], iteration_bounds = array<i64: 1, 1>, scalar_prefetch = 0 : i64, scratch_operands = 0 : i64, tpu.core_type = #tpu.core_type<tc>, window_params = [{transform_indices = @transform_0, window_bounds = array<i64: 8, 128>}, {transform_indices = @transform_1, window_bounds = array<i64: 256, 128>}, {transform_indices = @transform_2, window_bounds = array<i64: 1, 1>}, {transform_indices = @transform_3, window_bounds = array<i64: 8, 256>}]} {
    %c0 = arith.constant 0 : index
    %c0_0 = arith.constant 0 : index
    %0 = vector.load %arg2[%c0, %c0_0] : memref<8x128xf32, #tpu.memory_space<vmem>>, vector<8x128xf32>
    %c0_1 = arith.constant 0 : index
    %c0_2 = arith.constant 0 : index
    %1 = vector.load %arg3[%c0_1, %c0_2] : memref<256x128xf32, #tpu.memory_space<vmem>>, vector<256x128xf32>
    %cst = arith.constant dense<0.000000e+00> : vector<8x256xf32>
    %2 = tpu.matmul %0, %1, %cst {dimension_numbers = #tpu.dot_dimension_numbers<[1], [1], [0], [0], [0, 0, 1, 0], [], []>} : vector<8x128xf32>, vector<256x128xf32>, vector<8x256xf32> -> vector<8x256xf32>
    %c0_3 = arith.constant 0 : index
    %c0_4 = arith.constant 0 : index
    %3 = memref.load %arg4[%c0_3, %c0_4] : memref<1x1xf32, #tpu.memory_space<smem>>
    %4 = vector.broadcast %3 : f32 to vector<8x256xf32>
    %5 = arith.mulf %2, %4 : vector<8x256xf32>
    %c0_5 = arith.constant 0 : index
    %c0_6 = arith.constant 0 : index
    %6 = vector.load %arg5[%c0_5, %c0_6] : memref<8x256xf32, #tpu.memory_space<vmem>>, vector<8x256xf32>
    tpu.vector_store %arg5[%c0_5, %c0_6], %5 {strides = array<i32>} : memref<8x256xf32, #tpu.memory_space<vmem>>, vector<8x256xf32>,
    return
  }
  func.func @transform_0(%arg0: i32, %arg1: i32) -> (i32, i32) {
    %c0_i32 = arith.constant 0 : i32
    %c0_i32_0 = arith.constant 0 : i32
    return %arg0, %c0_i32 : i32, i32
  }
  func.func @transform_1(%arg0: i32, %arg1: i32) -> (i32, i32) {
    %c0_i32 = arith.constant 0 : i32
    %c0_i32_0 = arith.constant 0 : i32
    return %arg1, %c0_i32 : i32, i32
  }
  func.func @transform_2(%arg0: i32, %arg1: i32) -> (i32, i32) {
    %c0_i32 = arith.constant 0 : i32
    %c0_i32_0 = arith.constant 0 : i32
    %c0_i32_1 = arith.constant 0 : i32
    return %c0_i32, %c0_i32_0 : i32, i32
  }
  func.func @transform_3(%arg0: i32, %arg1: i32) -> (i32, i32) {
    %c0_i32 = arith.constant 0 : i32
    return %arg0, %arg1 : i32, i32
  }
}

</mosaic_0001>

<bundles_post_ra>
// kernel: non_parametric_classifier_forward.1
= control target key start
LH: loop header
LB: loop body
LE: loop exit
PB: predicated region body
PF: predicated region fallthrough
CT: control target
= control target key end

     0   :  { %s264_s0 = inlined_call_operand.vmem [shape: f32[8,128], index: 0, kind: input, shape index: {}]   ;;  %s265_s1 = inlined_call_operand.vmem [shape: f32[256,128], index: 1, kind: input, shape index: {}]   ;;  %s266_s2 = inlined_call_operand.<no memory space> [shape: f32[1,1], index: 2, kind: input, shape index: {}]   ;;  %s267_s3 = inlined_call_operand.hbm [shape: f32[8,256], index: 3, kind: output, shape index: {}]  }
   0x1   :  { %v32_v0 = vld [vmem:[%s265_s1 + $0x78] sm:$0xff]  ;;  %v31_v2 = vld [vmem:[%s265_s1 + $0x70] sm:$0xff]  ;;  %v30_v4 = vld [vmem:[%s265_s1 + $0x68] sm:$0xff] }
   0x2   :  { %v48_v1 = vld [vmem:[%s265_s1 + $0xf8] sm:$0xff]  ;;  %49 = vmatpush.xpose.msra.mxu0 %v32_v0  ;;  %v47_v3 = vld [vmem:[%s265_s1 + $0xf0] sm:$0xff]  ;;  %v46_v5 = vld [vmem:[%s265_s1 + $0xe8] sm:$0xff] }
   0x3   :  { %69 = vmatpush.xpose.msra.mxu1 %v48_v1 }
   0x6   :  { %50 = vmatpush.xpose.msra.mxu0 %v31_v2 }
   0x7   :  { %70 = vmatpush.xpose.msra.mxu1 %v47_v3 }
   0x8   :  { %9 = vsyncpa [#allocation4], 0  ;;  %v29_v6 = vld [vmem:[%s265_s1 + $0x60] sm:$0xff]  ;;  %v28_v8 = vld [vmem:[%s265_s1 + $0x58] sm:$0xff]  ;;  %v90_v33 = vstv %s266_s2  ;;  %s138_s26 = smov [#allocation3]   ;;  %s102_s30 = sshll.u32 %s267_s3, 4  ;;  %s103_s30 = int_to_ptr.hbm [resolvable:$true] %s102_s30 }
   0x9   :  { %v45_v7 = vld [vmem:[%s265_s1 + $0xe0] sm:$0xff]  ;;  %v44_v9 = vld [vmem:[%s265_s1 + $0xd8] sm:$0xff]  ;;  %v27_v10 = vld [vmem:[%s265_s1 + $0x50] sm:$0xff]  ;;  %s100_s27 = sshll.u32 %s138_s26, 4  ;;  %s101_s27 = int_to_ptr.vmem [resolvable:$true] %s100_s27 }
   0xa   :  { %51 = vmatpush.xpose.msra.mxu0 %v30_v4  ;;  %v43_v11 = vld [vmem:[%s265_s1 + $0xd0] sm:$0xff]  ;;  %v26_v12 = vld [vmem:[%s265_s1 + $0x48] sm:$0xff]  ;;  %v25_v14 = vld [vmem:[%s265_s1 + $0x40] sm:$0xff] }
   0xb   :  { %71 = vmatpush.xpose.msra.mxu1 %v46_v5  ;;  %v42_v13 = vld [vmem:[%s265_s1 + $0xc8] sm:$0xff]  ;;  %v41_v15 = vld [vmem:[%s265_s1 + $0xc0] sm:$0xff]  ;;  %v24_v16 = vld [vmem:[%s265_s1 + $0x38] sm:$0xff] }
   0xc   :  { %v40_v17 = vld [vmem:[%s265_s1 + $0xb8] sm:$0xff]  ;;  %v23_v18 = vld [vmem:[%s265_s1 + $0x30] sm:$0xff]  ;;  %v22_v20 = vld [vmem:[%s265_s1 + $0x28] sm:$0xff] }
   0xd   :  { %v39_v19 = vld [vmem:[%s265_s1 + $0xb0] sm:$0xff]  ;;  %v38_v21 = vld [vmem:[%s265_s1 + $0xa8] sm:$0xff]  ;;  %v21_v22 = vld [vmem:[%s265_s1 + $0x20] sm:$0xff] }
   0xe   :  { %52 = vmatpush.xpose.msra.mxu0 %v29_v6  ;;  %v37_v23 = vld [vmem:[%s265_s1 + $0xa0] sm:$0xff]  ;;  %v20_v24 = vld [vmem:[%s265_s1 + $0x18] sm:$0xff]  ;;  %v19_v26 = vld [vmem:[%s265_s1 + $0x10] sm:$0xff] }
   0xf   :  { %72 = vmatpush.xpose.msra.mxu1 %v45_v7  ;;  %v36_v25 = vld [vmem:[%s265_s1 + $0x98] sm:$0xff]  ;;  %v35_v27 = vld [vmem:[%s265_s1 + $0x90] sm:$0xff]  ;;  %v18_v28 = vld [vmem:[%s265_s1 + $0x8] sm:$0xff] }
  0x10   :  { %v34_v29 = vld [vmem:[%s265_s1 + $0x88] sm:$0xff]  ;;  %v17_v30 = vld [vmem:[%s265_s1] sm:$0xff] }
  0x11   :  { %v33_v31 = vld [vmem:[%s265_s1 + $0x80] sm:$0xff] }
  0x12   :  { %53 = vmatpush.xpose.msra.mxu0 %v28_v8  ;;  %v16_v32 = vld [vmem:[%s264_s0] sm:$0xff] }
  0x13   :  { %73 = vmatpush.xpose.msra.mxu1 %v44_v9 }
  0x16   :  { %54 = vmatpush.xpose.msra.mxu0 %v27_v10 }
  0x17   :  { %74 = vmatpush.xpose.msra.mxu1 %v43_v11 }
  0x1a   :  { %55 = vmatpush.xpose.msra.mxu0 %v26_v12 }
  0x1b   :  { %75 = vmatpush.xpose.msra.mxu1 %v42_v13 }
  0x1e   :  { %56 = vmatpush.xpose.msra.mxu0 %v25_v14 }
  0x1f   :  { %76 = vmatpush.xpose.msra.mxu1 %v41_v15 }
  0x22   :  { %57 = vmatpush.xpose.msra.mxu0 %v24_v16 }
  0x23   :  { %77 = vmatpush.xpose.msra.mxu1 %v40_v17 }
  0x26   :  { %58 = vmatpush.xpose.msra.mxu0 %v23_v18 }
  0x27   :  { %78 = vmatpush.xpose.msra.mxu1 %v39_v19 }
  0x2a   :  { %59 = vmatpush.xpose.msra.mxu0 %v22_v20 }
  0x2b   :  { %79 = vmatpush.xpose.msra.mxu1 %v38_v21 }
  0x2e   :  { %60 = vmatpush.xpose.msra.mxu0 %v21_v22 }
  0x2f   :  { %80 = vmatpush.xpose.msra.mxu1 %v37_v23 }
  0x32   :  { %61 = vmatpush.xpose.msra.mxu0 %v20_v24 }
  0x33   :  { %81 = vmatpush.xpose.msra.mxu1 %v36_v25 }
  0x36   :  { %62 = vmatpush.xpose.msra.mxu0 %v19_v26 }
  0x37   :  { %82 = vmatpush.xpose.msra.mxu1 %v35_v27 }
  0x3a   :  { %63 = vmatpush.xpose.msra.mxu0 %v18_v28 }
  0x3b   :  { %83 = vmatpush.xpose.msra.mxu1 %v34_v29 }
  0x3e   :  { %64 = vmatpush.xpose.msra.mxu0 %v17_v30 }
  0x3f   :  { %84 = vmatpush.xpose.msra.mxu1 %v33_v31 }
  0x41   :  { %65 = vmatmul.f32.vlgmr.msra.gmra.mxu0 %v16_v32 }
  0x42   :  { %85 = vmatmul.f32.vlgmr.msra.gmra.mxu1 %v16_v32 }
  0xbe   :  { %v66_v34 = vpop.f32.mrf.mxu0 }
  0xbf   :  { %v86_v35 = vpop.f32.mrf.mxu1  ;;  %v91_v36 = vmul.f32 %v90_v33, %v66_v34 }
  0xc0   :  { %v92_v37 = vmul.f32 %v90_v33, %v86_v35 }
  0xc1   :  { %93 = vst [vmem:[#allocation3] sm:$0xff] %v91_v36 }
  0xc2   :  { %94 = vst [vmem:[#allocation3 + $0x8] sm:$0xff] %v92_v37 }
  0xc3   :  { %105 = dma.vmem_to_hbm [thread:$0]  %s101_s27, 256, %s103_s30, [#allocation4]  }
  0xc4   :  { %136 = dma.done.wait [#allocation4], 256  }
  0xc5   :  { %137 = vsyncadd [#allocation4], 4294967040 }
  0xc6   :  { %110 = vsyncpa [#allocation4], 1 }

</bundles_post_ra>
